<compile_context>
chip_gen: v5e
topology: v5e:2x2
jax: 0.10.0
libtpu: 0.0.40
codegen_flags: <defaults>
</compile_context>

<pallas_src>
import math
import functools

import jax
import jax.numpy as jnp
from jax.experimental import pallas as pl
from jax.experimental.pallas import tpu as pltpu


def _mha_kernel(q_ref, k_ref, v_ref,
                wq_ref, bq_ref, wk_ref, bk_ref, wv_ref, bv_ref,
                wo_ref, bo_ref, gamma_ref, beta_ref,
                o_ref, *, num_heads: int, d_k: int, eps: float):
    """One (batch, q-tile) grid step.

    Blocks:
      q_ref            (1, TQ, D)   f32 query rows for this tile
      k_ref, v_ref     (1, L,  D)   f32 full key/value sequence
      w{q,k,v}_ref     (H, D, d_k)  bf16 per-head projection weights
      b{q,k,v}_ref     (H, 1, d_k)  f32 per-head projection biases
      wo_ref           (H, d_k, D)  bf16 per-head slices of the output proj
      bo/gamma/beta    (1, D)       f32
      o_ref            (1, TQ, D)   f32 output
    """
    h = num_heads
    tq = q_ref.shape[1]
    lk = k_ref.shape[1]
    dm = q_ref.shape[2]

    # bf16 MXU operands, f32 accumulation.
    q = q_ref[0].astype(jnp.bfloat16)                       # (TQ, D)
    k = k_ref[0].astype(jnp.bfloat16)                       # (L,  D)
    v = v_ref[0].astype(jnp.bfloat16)                       # (L,  D)

    # Heads live on a leading batch dim: no lane-axis slicing / concat.
    q_b = jnp.broadcast_to(q, (h, tq, dm))
    k_b = jnp.broadcast_to(k, (h, lk, dm))
    v_b = jnp.broadcast_to(v, (h, lk, dm))

    # Per-head input projections (batched over heads).
    qh = jnp.einsum('hsd,hdf->hsf', q_b, wq_ref[...],
                    preferred_element_type=jnp.float32) + bq_ref[...]
    kh = jnp.einsum('htd,hdf->htf', k_b, wk_ref[...],
                    preferred_element_type=jnp.float32) + bk_ref[...]
    vh = jnp.einsum('htd,hdf->htf', v_b, wv_ref[...],
                    preferred_element_type=jnp.float32) + bv_ref[...]

    # Scaled dot-product attention, all heads batched: scores (H, TQ, L).
    scale = 1.0 / math.sqrt(d_k)
    s = jnp.einsum('hsf,htf->hst',
                   qh.astype(jnp.bfloat16), kh.astype(jnp.bfloat16),
                   preferred_element_type=jnp.float32) * scale

    # Softmax over keys in f32; denominator via the (otherwise idle) EUP.
    s = s - jnp.max(s, axis=-1, keepdims=True)
    p = jnp.exp(s)
    p = p * pl.reciprocal(jnp.sum(p, axis=-1, keepdims=True), approx=True)

    ctx = jnp.einsum('hst,htf->hsf',
                     p.astype(jnp.bfloat16), vh.astype(jnp.bfloat16),
                     preferred_element_type=jnp.float32)     # (H, TQ, d_k)

    # Output projection: per-head (d_k, D) slices whose partial products are
    # summed over heads.  Every MXU output here is lane-dense on the full
    # d_model; the PyTorch head concat disappears into the head sum.
    out = jnp.einsum('hsf,hfd->hsd',
                     ctx.astype(jnp.bfloat16), wo_ref[...],
                     preferred_element_type=jnp.float32)     # (H, TQ, D)
    out = jnp.sum(out, axis=0) + bo_ref[...]                 # (TQ, D)

    # Residual + LayerNorm.  Module: norm(out + dropout(out)) == LN(2*out) in
    # eval mode.  Fold the 2x into the constants:
    #   LN(2y) = (y - mean(y)) * rsqrt(var(y) + eps/4) * gamma + beta
    # so we normalize `out` directly and skip the explicit `out + out` pass.
    mu = jnp.mean(out, axis=-1, keepdims=True)
    dev = out - mu
    var = jnp.mean(dev * dev, axis=-1, keepdims=True)
    normed = dev * jax.lax.rsqrt(var + eps * 0.25)
    o_ref[0] = (normed * gamma_ref[...] + beta_ref[...]).astype(o_ref.dtype)


def multi_headed_attention(query, key, value, params, *, num_heads, eps=1e-5):
    """query/key/value: (B, L, d_model) f32.  Returns (B, L, d_model) f32."""
    B, L, D = query.shape
    assert D % num_heads == 0
    d_k = D // num_heads
    (wq, bq, wk, bk, wv, bv, wo, bo, gamma, beta) = params

    # Host-side per-head re-layout of the weights so the kernel never slices
    # or concatenates heads on the lane axis.  Weights ship as bf16 (halves
    # weight DMA); biases / LayerNorm params stay f32.
    def split_in(w):      # (D, D) in x@W layout -> (H, D, d_k)
        return w.reshape(D, num_heads, d_k).transpose(1, 0, 2).astype(jnp.bfloat16)

    def split_bias(b):    # (D,) -> (H, 1, d_k)
        return b.reshape(num_heads, 1, d_k).astype(jnp.float32)

    wq_h, wk_h, wv_h = split_in(wq), split_in(wk), split_in(wv)
    bq_h, bk_h, bv_h = split_bias(bq), split_bias(bk), split_bias(bv)
    wo_h = wo.reshape(num_heads, d_k, D).astype(jnp.bfloat16)   # (H, d_k, D)
    bo_2 = bo.reshape(1, D).astype(jnp.float32)
    gamma_2 = gamma.reshape(1, D).astype(jnp.float32)
    beta_2 = beta.reshape(1, D).astype(jnp.float32)

    # Grid: (batch, q-tiles), both "parallel".  At these toy shapes TQ == L so
    # there is exactly one q tile per batch element.
    tq = min(L, 128)
    nq = pl.cdiv(L, tq)

    q_spec = pl.BlockSpec((1, tq, D), lambda b, qi: (b, qi, 0))
    kv_spec = pl.BlockSpec((1, L, D), lambda b, qi: (b, 0, 0))
    # Constant block index -> the weight tiles stay resident in VMEM across
    # all grid steps (no re-DMA).
    w_in_spec = pl.BlockSpec((num_heads, D, d_k), lambda b, qi: (0, 0, 0))
    b_in_spec = pl.BlockSpec((num_heads, 1, d_k), lambda b, qi: (0, 0, 0))
    w_out_spec = pl.BlockSpec((num_heads, d_k, D), lambda b, qi: (0, 0, 0))
    vec_spec = pl.BlockSpec((1, D), lambda b, qi: (0, 0))

    kernel = functools.partial(_mha_kernel, num_heads=num_heads, d_k=d_k, eps=eps)

    return pl.pallas_call(
        kernel,
        out_shape=jax.ShapeDtypeStruct((B, L, D), jnp.float32),
        grid_spec=pltpu.PrefetchScalarGridSpec(
            num_scalar_prefetch=0,
            grid=(B, nq),
            in_specs=[
                q_spec, kv_spec, kv_spec,       # q, k, v
                w_in_spec, b_in_spec,           # Wq, bq
                w_in_spec, b_in_spec,           # Wk, bk
                w_in_spec, b_in_spec,           # Wv, bv
                w_out_spec, vec_spec,           # Wo, bo
                vec_spec, vec_spec,             # gamma, beta
            ],
            out_specs=q_spec,
        ),
        compiler_params=pltpu.CompilerParams(
            dimension_semantics=("parallel", "parallel"),
            vmem_limit_bytes=32 * 1024 * 1024),   # explicit budget, fits all gens
    )(query, key, value,
      wq_h, bq_h, wk_h, bk_h, wv_h, bv_h, wo_h, bo_2, gamma_2, beta_2)


def _reference(query, key, value, params, *, num_heads, eps=1e-5,
               bf16_matmuls=False):
    """Plain-JAX reference mirroring the PyTorch forward (eval mode).

    With bf16_matmuls=True it rounds matmul operands to bf16 at the same
    points as the kernel (f32 accumulation), so the comparison against the
    kernel can be tight; with False it is the pure-f32 module semantics.
    """
    (wq, bq, wk, bk, wv, bv, wo, bo, gamma, beta) = params
    B, L, D = query.shape
    d_k = D // num_heads

    def mm(a, b):
        if bf16_matmuls:
            a = a.astype(jnp.bfloat16)
            b = b.astype(jnp.bfloat16)
        return jnp.matmul(a, b, preferred_element_type=jnp.float32)

    def proj(x, w, bvec):
        y = mm(x, w) + bvec
        return y.reshape(B, L, num_heads, d_k).transpose(0, 2, 1, 3)

    q = proj(query, wq, bq)
    k = proj(key, wk, bk)
    v = proj(value, wv, bv)
    s = mm(q, k.transpose(0, 1, 3, 2)) / math.sqrt(d_k)
    p = jax.nn.softmax(s, axis=-1)
    ctx = mm(p, v)
    ctx = ctx.transpose(0, 2, 1, 3).reshape(B, L, D)
    out = mm(ctx, wo) + bo
    y = 2.0 * out                          # out + dropout(out), eval mode
    mu = jnp.mean(y, axis=-1, keepdims=True)
    var = jnp.mean((y - mu) ** 2, axis=-1, keepdims=True)
    return (y - mu) / jnp.sqrt(var + eps) * gamma + beta


if __name__ == "__main__":
    B, L, H, D_MODEL = 2, 8, 4, 32

    key0 = jax.random.PRNGKey(0)
    ks = jax.random.split(key0, 11)

    def lin_w(kw, d_in, d_out):
        bound = 1.0 / math.sqrt(d_in)
        return jax.random.uniform(kw, (d_in, d_out), jnp.float32, -bound, bound)

    wq = lin_w(ks[0], D_MODEL, D_MODEL)
    wk = lin_w(ks[1], D_MODEL, D_MODEL)
    wv = lin_w(ks[2], D_MODEL, D_MODEL)
    wo = lin_w(ks[3], D_MODEL, D_MODEL)
    bq = jax.random.normal(ks[4], (D_MODEL,), jnp.float32) * 0.02
    bk = jax.random.normal(ks[5], (D_MODEL,), jnp.float32) * 0.02
    bv = jax.random.normal(ks[6], (D_MODEL,), jnp.float32) * 0.02
    bo = jax.random.normal(ks[7], (D_MODEL,), jnp.float32) * 0.02
    gamma = jnp.ones((D_MODEL,), jnp.float32)      # LayerNorm default init
    beta = jnp.zeros((D_MODEL,), jnp.float32)
    params = (wq, bq, wk, bk, wv, bv, wo, bo, gamma, beta)

    query = jax.random.normal(ks[8], (B, L, D_MODEL), jnp.float32)
    key_t = jax.random.normal(ks[9], (B, L, D_MODEL), jnp.float32)
    value = jax.random.normal(ks[10], (B, L, D_MODEL), jnp.float32)

    out = multi_headed_attention(query, key_t, value, params, num_heads=H)
    out = jax.block_until_ready(out)
    assert out.shape == (B, L, D_MODEL)

    # Tight check against a reference with the same bf16 matmul-operand
    # rounding (differences: MXU accumulation order, approx reciprocal).
    ref_bf16 = _reference(query, key_t, value, params, num_heads=H,
                          bf16_matmuls=True)
    assert jnp.allclose(out, ref_bf16, atol=2e-2, rtol=2e-2), (
        "kernel mismatch vs bf16-emulating reference: "
        f"{float(jnp.max(jnp.abs(out - ref_bf16)))}")

    # Looser check against the pure-f32 module semantics (gap is solely the
    # bf16 MXU operands).
    ref_f32 = _reference(query, key_t, value, params, num_heads=H,
                         bf16_matmuls=False)
    assert jnp.allclose(out, ref_f32, atol=1e-1, rtol=1e-1), (
        "kernel mismatch vs f32 reference: "
        f"{float(jnp.max(jnp.abs(out - ref_f32)))}")

    print("KERNEL_OK")
</pallas_src>

<mosaic_0001>
module attributes {stable_mosaic.version = 11 : i64} {
  func.func @_mha_kernel(%arg0: i32, %arg1: i32, %arg2: memref<1x8x32xf32, #tpu.memory_space<vmem>>, %arg3: memref<1x8x32xf32, #tpu.memory_space<vmem>>, %arg4: memref<1x8x32xf32, #tpu.memory_space<vmem>>, %arg5: memref<4x32x8xbf16, #tpu.memory_space<vmem>>, %arg6: memref<4x1x8xf32, #tpu.memory_space<vmem>>, %arg7: memref<4x32x8xbf16, #tpu.memory_space<vmem>>, %arg8: memref<4x1x8xf32, #tpu.memory_space<vmem>>, %arg9: memref<4x32x8xbf16, #tpu.memory_space<vmem>>, %arg10: memref<4x1x8xf32, #tpu.memory_space<vmem>>, %arg11: memref<4x8x32xbf16, #tpu.memory_space<vmem>>, %arg12: memref<1x32xf32, #tpu.memory_space<vmem>>, %arg13: memref<1x32xf32, #tpu.memory_space<vmem>>, %arg14: memref<1x32xf32, #tpu.memory_space<vmem>>, %arg15: memref<1x8x32xf32, #tpu.memory_space<vmem>>) attributes {dimension_semantics = [#tpu.dimension_semantics<parallel>, #tpu.dimension_semantics<parallel>], iteration_bounds = array<i64: 2, 1>, scalar_prefetch = 0 : i64, scratch_operands = 0 : i64, tpu.core_type = #tpu.core_type<tc>, window_params = [{transform_indices = @transform_0, window_bounds = array<i64: 1, 8, 32>}, {transform_indices = @transform_1, window_bounds = array<i64: 1, 8, 32>}, {transform_indices = @transform_2, window_bounds = array<i64: 1, 8, 32>}, {pipeline_mode = #tpu.pipeline_mode<synchronous>, transform_indices = @transform_3, window_bounds = array<i64: 4, 32, 8>}, {pipeline_mode = #tpu.pipeline_mode<synchronous>, transform_indices = @transform_4, window_bounds = array<i64: 4, 1, 8>}, {pipeline_mode = #tpu.pipeline_mode<synchronous>, transform_indices = @transform_5, window_bounds = array<i64: 4, 32, 8>}, {pipeline_mode = #tpu.pipeline_mode<synchronous>, transform_indices = @transform_6, window_bounds = array<i64: 4, 1, 8>}, {pipeline_mode = #tpu.pipeline_mode<synchronous>, transform_indices = @transform_7, window_bounds = array<i64: 4, 32, 8>}, {pipeline_mode = #tpu.pipeline_mode<synchronous>, transform_indices = @transform_8, window_bounds = array<i64: 4, 1, 8>}, {pipeline_mode = #tpu.pipeline_mode<synchronous>, transform_indices = @transform_9, window_bounds = array<i64: 4, 8, 32>}, {pipeline_mode = #tpu.pipeline_mode<synchronous>, transform_indices = @transform_10, window_bounds = array<i64: 1, 32>}, {pipeline_mode = #tpu.pipeline_mode<synchronous>, transform_indices = @transform_11, window_bounds = array<i64: 1, 32>}, {pipeline_mode = #tpu.pipeline_mode<synchronous>, transform_indices = @transform_12, window_bounds = array<i64: 1, 32>}, {transform_indices = @transform_13, window_bounds = array<i64: 1, 8, 32>}]} {
    %c0 = arith.constant 0 : index
    %c0_0 = arith.constant 0 : index
    %c0_1 = arith.constant 0 : index
    %0 = vector.load %arg2[%c0, %c0_0, %c0_1] : memref<1x8x32xf32, #tpu.memory_space<vmem>>, vector<1x8x32xf32>
    %1 = vector.shape_cast %0 : vector<1x8x32xf32> to vector<8x32xf32>
    %2 = arith.truncf %1 : vector<8x32xf32> to vector<8x32xbf16>
    %c0_2 = arith.constant 0 : index
    %c0_3 = arith.constant 0 : index
    %c0_4 = arith.constant 0 : index
    %3 = vector.load %arg3[%c0_2, %c0_3, %c0_4] : memref<1x8x32xf32, #tpu.memory_space<vmem>>, vector<1x8x32xf32>
    %4 = vector.shape_cast %3 : vector<1x8x32xf32> to vector<8x32xf32>
    %5 = arith.truncf %4 : vector<8x32xf32> to vector<8x32xbf16>
    %c0_5 = arith.constant 0 : index
    %c0_6 = arith.constant 0 : index
    %c0_7 = arith.constant 0 : index
    %6 = vector.load %arg4[%c0_5, %c0_6, %c0_7] : memref<1x8x32xf32, #tpu.memory_space<vmem>>, vector<1x8x32xf32>
    %7 = vector.shape_cast %6 : vector<1x8x32xf32> to vector<8x32xf32>
    %8 = arith.truncf %7 : vector<8x32xf32> to vector<8x32xbf16>
    %9 = vector.shape_cast %2 : vector<8x32xbf16> to vector<1x8x32xbf16>
    %10 = vector.broadcast %9 : vector<1x8x32xbf16> to vector<4x8x32xbf16>
    %11 = vector.shape_cast %5 : vector<8x32xbf16> to vector<1x8x32xbf16>
    %12 = vector.broadcast %11 : vector<1x8x32xbf16> to vector<4x8x32xbf16>
    %13 = vector.shape_cast %8 : vector<8x32xbf16> to vector<1x8x32xbf16>
    %14 = vector.broadcast %13 : vector<1x8x32xbf16> to vector<4x8x32xbf16>
    %c0_8 = arith.constant 0 : index
    %c0_9 = arith.constant 0 : index
    %c0_10 = arith.constant 0 : index
    %15 = vector.load %arg5[%c0_8, %c0_9, %c0_10] : memref<4x32x8xbf16, #tpu.memory_space<vmem>>, vector<4x32x8xbf16>
    "tpu.trace_start"() <{level = 10 : i32, message = "hsd,hdf->hsf"}> : () -> ()
    %cst = arith.constant dense<0.000000e+00> : vector<4x8x8xf32>
    %16 = tpu.matmul %10, %15, %cst {dimension_numbers = #tpu.dot_dimension_numbers<[2], [1], [1], [2], [0, 0, 0, 1, 1, 2], [0], [0]>} : vector<4x8x32xbf16>, vector<4x32x8xbf16>, vector<4x8x8xf32> -> vector<4x8x8xf32>
    "tpu.trace_stop"() : () -> ()
    %c0_11 = arith.constant 0 : index
    %c0_12 = arith.constant 0 : index
    %c0_13 = arith.constant 0 : index
    %17 = vector.load %arg6[%c0_11, %c0_12, %c0_13] : memref<4x1x8xf32, #tpu.memory_space<vmem>>, vector<4x1x8xf32>
    %18 = vector.broadcast %17 : vector<4x1x8xf32> to vector<4x8x8xf32>
    %19 = arith.addf %16, %18 : vector<4x8x8xf32>
    %c0_14 = arith.constant 0 : index
    %c0_15 = arith.constant 0 : index
    %c0_16 = arith.constant 0 : index
    %20 = vector.load %arg7[%c0_14, %c0_15, %c0_16] : memref<4x32x8xbf16, #tpu.memory_space<vmem>>, vector<4x32x8xbf16>
    "tpu.trace_start"() <{level = 10 : i32, message = "htd,hdf->htf"}> : () -> ()
    %cst_17 = arith.constant dense<0.000000e+00> : vector<4x8x8xf32>
    %21 = tpu.matmul %12, %20, %cst_17 {dimension_numbers = #tpu.dot_dimension_numbers<[2], [1], [1], [2], [0, 0, 0, 1, 1, 2], [0], [0]>} : vector<4x8x32xbf16>, vector<4x32x8xbf16>, vector<4x8x8xf32> -> vector<4x8x8xf32>
    "tpu.trace_stop"() : () -> ()
    %c0_18 = arith.constant 0 : index
    %c0_19 = arith.constant 0 : index
    %c0_20 = arith.constant 0 : index
    %22 = vector.load %arg8[%c0_18, %c0_19, %c0_20] : memref<4x1x8xf32, #tpu.memory_space<vmem>>, vector<4x1x8xf32>
    %23 = vector.broadcast %22 : vector<4x1x8xf32> to vector<4x8x8xf32>
    %24 = arith.addf %21, %23 : vector<4x8x8xf32>
    %c0_21 = arith.constant 0 : index
    %c0_22 = arith.constant 0 : index
    %c0_23 = arith.constant 0 : index
    %25 = vector.load %arg9[%c0_21, %c0_22, %c0_23] : memref<4x32x8xbf16, #tpu.memory_space<vmem>>, vector<4x32x8xbf16>
    "tpu.trace_start"() <{level = 10 : i32, message = "htd,hdf->htf"}> : () -> ()
    %cst_24 = arith.constant dense<0.000000e+00> : vector<4x8x8xf32>
    %26 = tpu.matmul %14, %25, %cst_24 {dimension_numbers = #tpu.dot_dimension_numbers<[2], [1], [1], [2], [0, 0, 0, 1, 1, 2], [0], [0]>} : vector<4x8x32xbf16>, vector<4x32x8xbf16>, vector<4x8x8xf32> -> vector<4x8x8xf32>
    "tpu.trace_stop"() : () -> ()
    %c0_25 = arith.constant 0 : index
    %c0_26 = arith.constant 0 : index
    %c0_27 = arith.constant 0 : index
    %27 = vector.load %arg10[%c0_25, %c0_26, %c0_27] : memref<4x1x8xf32, #tpu.memory_space<vmem>>, vector<4x1x8xf32>
    %28 = vector.broadcast %27 : vector<4x1x8xf32> to vector<4x8x8xf32>
    %29 = arith.addf %26, %28 : vector<4x8x8xf32>
    %30 = arith.truncf %19 : vector<4x8x8xf32> to vector<4x8x8xbf16>
    %31 = arith.truncf %24 : vector<4x8x8xf32> to vector<4x8x8xbf16>
    "tpu.trace_start"() <{level = 10 : i32, message = "hsf,htf->hst"}> : () -> ()
    %cst_28 = arith.constant dense<0.000000e+00> : vector<4x8x8xf32>
    %32 = tpu.matmul %30, %31, %cst_28 {dimension_numbers = #tpu.dot_dimension_numbers<[2], [2], [1], [1], [0, 0, 0, 1, 1, 1], [0], [0]>} : vector<4x8x8xbf16>, vector<4x8x8xbf16>, vector<4x8x8xf32> -> vector<4x8x8xf32>
    "tpu.trace_stop"() : () -> ()
    %cst_29 = arith.constant 0.353553385 : f32
    %33 = vector.broadcast %cst_29 : f32 to vector<4x8x8xf32>
    %34 = arith.mulf %32, %33 : vector<4x8x8xf32>
    %cst_30 = arith.constant dense<0xFF800000> : vector<4x8xf32>
    %35 = vector.multi_reduction <maximumf>, %34, %cst_30 [2] : vector<4x8x8xf32> to vector<4x8xf32>
    %36 = vector.shape_cast %35 : vector<4x8xf32> to vector<4x8x1xf32>
    %37 = vector.broadcast %36 : vector<4x8x1xf32> to vector<4x8x8xf32>
    %38 = arith.subf %34, %37 : vector<4x8x8xf32>
    %39 = math.exp %38 : vector<4x8x8xf32>
    %cst_31 = arith.constant dense<0.000000e+00> : vector<4x8xf32>
    %40 = vector.multi_reduction <add>, %39, %cst_31 [2] : vector<4x8x8xf32> to vector<4x8xf32>
    %41 = vector.shape_cast %40 : vector<4x8xf32> to vector<4x8x1xf32>
    %42 = tpu.reciprocal %41 {approx = true} : vector<4x8x1xf32> -> vector<4x8x1xf32>
    %43 = vector.broadcast %42 : vector<4x8x1xf32> to vector<4x8x8xf32>
    %44 = arith.mulf %39, %43 : vector<4x8x8xf32>
    %45 = arith.truncf %44 : vector<4x8x8xf32> to vector<4x8x8xbf16>
    %46 = arith.truncf %29 : vector<4x8x8xf32> to vector<4x8x8xbf16>
    "tpu.trace_start"() <{level = 10 : i32, message = "hst,htf->hsf"}> : () -> ()
    %cst_32 = arith.constant dense<0.000000e+00> : vector<4x8x8xf32>
    %47 = tpu.matmul %45, %46, %cst_32 {dimension_numbers = #tpu.dot_dimension_numbers<[2], [1], [1], [2], [0, 0, 0, 1, 1, 2], [0], [0]>} : vector<4x8x8xbf16>, vector<4x8x8xbf16>, vector<4x8x8xf32> -> vector<4x8x8xf32>
    "tpu.trace_stop"() : () -> ()
    %48 = arith.truncf %47 : vector<4x8x8xf32> to vector<4x8x8xbf16>
    %c0_33 = arith.constant 0 : index
    %c0_34 = arith.constant 0 : index
    %c0_35 = arith.constant 0 : index
    %49 = vector.load %arg11[%c0_33, %c0_34, %c0_35] : memref<4x8x32xbf16, #tpu.memory_space<vmem>>, vector<4x8x32xbf16>
    "tpu.trace_start"() <{level = 10 : i32, message = "hsf,hfd->hsd"}> : () -> ()
    %cst_36 = arith.constant dense<0.000000e+00> : vector<4x8x32xf32>
    %50 = tpu.matmul %48, %49, %cst_36 {dimension_numbers = #tpu.dot_dimension_numbers<[2], [1], [1], [2], [0, 0, 0, 1, 1, 2], [0], [0]>} : vector<4x8x8xbf16>, vector<4x8x32xbf16>, vector<4x8x32xf32> -> vector<4x8x32xf32>
    "tpu.trace_stop"() : () -> ()
    %cst_37 = arith.constant dense<0.000000e+00> : vector<8x32xf32>
    %51 = vector.multi_reduction <add>, %50, %cst_37 [0] : vector<4x8x32xf32> to vector<8x32xf32>
    %c0_38 = arith.constant 0 : index
    %c0_39 = arith.constant 0 : index
    %52 = vector.load %arg12[%c0_38, %c0_39] : memref<1x32xf32, #tpu.memory_space<vmem>>, vector<1x32xf32>
    %53 = vector.broadcast %52 : vector<1x32xf32> to vector<8x32xf32>
    %54 = arith.addf %51, %53 : vector<8x32xf32>
    %cst_40 = arith.constant dense<0.000000e+00> : vector<8xf32>
    %55 = vector.multi_reduction <add>, %54, %cst_40 [1] : vector<8x32xf32> to vector<8xf32>
    %56 = vector.shape_cast %55 : vector<8xf32> to vector<8x1xf32>
    %cst_41 = arith.constant 3.200000e+01 : f32
    %57 = vector.broadcast %cst_41 : f32 to vector<8x1xf32>
    %58 = arith.divf %56, %57 : vector<8x1xf32>
    %59 = vector.broadcast %58 : vector<8x1xf32> to vector<8x32xf32>
    %60 = arith.subf %54, %59 : vector<8x32xf32>
    %61 = arith.mulf %60, %60 : vector<8x32xf32>
    %cst_42 = arith.constant dense<0.000000e+00> : vector<8xf32>
    %62 = vector.multi_reduction <add>, %61, %cst_42 [1] : vector<8x32xf32> to vector<8xf32>
    %63 = vector.shape_cast %62 : vector<8xf32> to vector<8x1xf32>
    %cst_43 = arith.constant 3.200000e+01 : f32
    %64 = vector.broadcast %cst_43 : f32 to vector<8x1xf32>
    %65 = arith.divf %63, %64 : vector<8x1xf32>
    %cst_44 = arith.constant 2.500000e-06 : f32
    %66 = vector.broadcast %cst_44 : f32 to vector<8x1xf32>
    %67 = arith.addf %65, %66 : vector<8x1xf32>
    %68 = math.rsqrt %67 : vector<8x1xf32>
    %69 = vector.broadcast %68 : vector<8x1xf32> to vector<8x32xf32>
    %70 = arith.mulf %60, %69 : vector<8x32xf32>
    %c0_45 = arith.constant 0 : index
    %c0_46 = arith.constant 0 : index
    %71 = vector.load %arg13[%c0_45, %c0_46] : memref<1x32xf32, #tpu.memory_space<vmem>>, vector<1x32xf32>
    %72 = vector.broadcast %71 : vector<1x32xf32> to vector<8x32xf32>
    %73 = arith.mulf %70, %72 : vector<8x32xf32>
    %c0_47 = arith.constant 0 : index
    %c0_48 = arith.constant 0 : index
    %74 = vector.load %arg14[%c0_47, %c0_48] : memref<1x32xf32, #tpu.memory_space<vmem>>, vector<1x32xf32>
    %75 = vector.broadcast %74 : vector<1x32xf32> to vector<8x32xf32>
    %76 = arith.addf %73, %75 : vector<8x32xf32>
    %c0_49 = arith.constant 0 : index
    %c0_50 = arith.constant 0 : index
    %c0_51 = arith.constant 0 : index
    %77 = vector.load %arg15[%c0_49, %c0_50, %c0_51] : memref<1x8x32xf32, #tpu.memory_space<vmem>>, vector<1x8x32xf32>
    %78 = vector.shape_cast %77 : vector<1x8x32xf32> to vector<8x32xf32>
    %79 = vector.shape_cast %76 : vector<8x32xf32> to vector<1x8x32xf32>
    tpu.vector_store %arg15[%c0_49, %c0_50, %c0_51], %79 {strides = array<i32>} : memref<1x8x32xf32, #tpu.memory_space<vmem>>, vector<1x8x32xf32>,
    return
  }
  func.func @transform_0(%arg0: i32, %arg1: i32) -> (i32, i32, i32) {
    %c0_i32 = arith.constant 0 : i32
    %c0_i32_0 = arith.constant 0 : i32
    return %arg0, %arg1, %c0_i32 : i32, i32, i32
  }
  func.func @transform_1(%arg0: i32, %arg1: i32) -> (i32, i32, i32) {
    %c0_i32 = arith.constant 0 : i32
    %c0_i32_0 = arith.constant 0 : i32
    %c0_i32_1 = arith.constant 0 : i32
    return %arg0, %c0_i32, %c0_i32_0 : i32, i32, i32
  }
  func.func @transform_2(%arg0: i32, %arg1: i32) -> (i32, i32, i32) {
    %c0_i32 = arith.constant 0 : i32
    %c0_i32_0 = arith.constant 0 : i32
    %c0_i32_1 = arith.constant 0 : i32
    return %arg0, %c0_i32, %c0_i32_0 : i32, i32, i32
  }
  func.func @transform_3(%arg0: i32, %arg1: i32) -> (i32, i32, i32) {
    %c0_i32 = arith.constant 0 : i32
    %c0_i32_0 = arith.constant 0 : i32
    %c0_i32_1 = arith.constant 0 : i32
    %c0_i32_2 = arith.constant 0 : i32
    return %c0_i32, %c0_i32_0, %c0_i32_1 : i32, i32, i32
  }
  func.func @transform_4(%arg0: i32, %arg1: i32) -> (i32, i32, i32) {
    %c0_i32 = arith.constant 0 : i32
    %c0_i32_0 = arith.constant 0 : i32
    %c0_i32_1 = arith.constant 0 : i32
    %c0_i32_2 = arith.constant 0 : i32
    return %c0_i32, %c0_i32_0, %c0_i32_1 : i32, i32, i32
  }
  func.func @transform_5(%arg0: i32, %arg1: i32) -> (i32, i32, i32) {
    %c0_i32 = arith.constant 0 : i32
    %c0_i32_0 = arith.constant 0 : i32
    %c0_i32_1 = arith.constant 0 : i32
    %c0_i32_2 = arith.constant 0 : i32
    return %c0_i32, %c0_i32_0, %c0_i32_1 : i32, i32, i32
  }
  func.func @transform_6(%arg0: i32, %arg1: i32) -> (i32, i32, i32) {
    %c0_i32 = arith.constant 0 : i32
    %c0_i32_0 = arith.constant 0 : i32
    %c0_i32_1 = arith.constant 0 : i32
    %c0_i32_2 = arith.constant 0 : i32
    return %c0_i32, %c0_i32_0, %c0_i32_1 : i32, i32, i32
  }
  func.func @transform_7(%arg0: i32, %arg1: i32) -> (i32, i32, i32) {
    %c0_i32 = arith.constant 0 : i32
    %c0_i32_0 = arith.constant 0 : i32
    %c0_i32_1 = arith.constant 0 : i32
    %c0_i32_2 = arith.constant 0 : i32
    return %c0_i32, %c0_i32_0, %c0_i32_1 : i32, i32, i32
  }
  func.func @transform_8(%arg0: i32, %arg1: i32) -> (i32, i32, i32) {
    %c0_i32 = arith.constant 0 : i32
    %c0_i32_0 = arith.constant 0 : i32
    %c0_i32_1 = arith.constant 0 : i32
    %c0_i32_2 = arith.constant 0 : i32
    return %c0_i32, %c0_i32_0, %c0_i32_1 : i32, i32, i32
  }
  func.func @transform_9(%arg0: i32, %arg1: i32) -> (i32, i32, i32) {
    %c0_i32 = arith.constant 0 : i32
    %c0_i32_0 = arith.constant 0 : i32
    %c0_i32_1 = arith.constant 0 : i32
    %c0_i32_2 = arith.constant 0 : i32
    return %c0_i32, %c0_i32_0, %c0_i32_1 : i32, i32, i32
  }
  func.func @transform_10(%arg0: i32, %arg1: i32) -> (i32, i32) {
    %c0_i32 = arith.constant 0 : i32
    %c0_i32_0 = arith.constant 0 : i32
    %c0_i32_1 = arith.constant 0 : i32
    return %c0_i32, %c0_i32_0 : i32, i32
  }
  func.func @transform_11(%arg0: i32, %arg1: i32) -> (i32, i32) {
    %c0_i32 = arith.constant 0 : i32
    %c0_i32_0 = arith.constant 0 : i32
    %c0_i32_1 = arith.constant 0 : i32
    return %c0_i32, %c0_i32_0 : i32, i32
  }
  func.func @transform_12(%arg0: i32, %arg1: i32) -> (i32, i32) {
    %c0_i32 = arith.constant 0 : i32
    %c0_i32_0 = arith.constant 0 : i32
    %c0_i32_1 = arith.constant 0 : i32
    return %c0_i32, %c0_i32_0 : i32, i32
  }
  func.func @transform_13(%arg0: i32, %arg1: i32) -> (i32, i32, i32) {
    %c0_i32 = arith.constant 0 : i32
    %c0_i32_0 = arith.constant 0 : i32
    return %arg0, %arg1, %c0_i32 : i32, i32, i32
  }
}

</mosaic_0001>

<bundles_post_ra>
// kernel: tpu_custom_call.1
= control target key start
LH: loop header
LB: loop body
LE: loop exit
PB: predicated region body
PF: predicated region fallthrough
CT: control target
= control target key end

     0   :  { %18 = vsyncpa [#allocation3], 0  ;;  %s2061_s0 = inlined_call_operand.vmem [shape: f32[2,8,32], index: 0, kind: input, shape index: {}]   ;;  %s2062_s1 = inlined_call_operand.vmem [shape: f32[2,8,32], index: 1, kind: input, shape index: {}]   ;;  %s2063_s2 = inlined_call_operand.vmem [shape: f32[2,8,32], index: 2, kind: input, shape index: {}]   ;;  %s2064_s3 = inlined_call_operand.vmem [shape: bf16[4,32,8], index: 3, kind: input, shape index: {}]   ;;  %s2065_s4 = inlined_call_operand.vmem [shape: f32[4,1,8], index: 4, kind: input, shape index: {}]   ;;  %s2066_s5 = inlined_call_operand.vmem [shape: bf16[4,32,8], index: 5, kind: input, shape index: {}]   ;;  %s2067_s6 = inlined_call_operand.vmem [shape: f32[4,1,8], index: 6, kind: input, shape index: {}]   ;;  %s2068_s7 = inlined_call_operand.vmem [shape: bf16[4,32,8], index: 7, kind: input, shape index: {}]   ;;  %s2069_s8 = inlined_call_operand.vmem [shape: f32[4,1,8], index: 8, kind: input, shape index: {}]   ;;  %s2070_s9 = inlined_call_operand.vmem [shape: bf16[4,8,32], index: 9, kind: input, shape index: {}]   ;;  %s2071_s10 = inlined_call_operand.vmem [shape: f32[1,32], index: 10, kind: input, shape index: {}]   ;;  %s2072_s11 = inlined_call_operand.vmem [shape: f32[1,32], index: 11, kind: input, shape index: {}]   ;;  %s2073_s12 = inlined_call_operand.vmem [shape: f32[1,32], index: 12, kind: input, shape index: {}]   ;;  %s2074_s13 = inlined_call_operand.hbm [shape: f32[2,8,32], index: 13, kind: output, shape index: {}]  }
   0x1   :  { %20 = vsyncpa [#allocation3 + $0x1], 0  ;;  %s1773_s25 = smov 0   ;;  %s1775_s26 = smov 0  }
   0x2   :  { %s1777_s27 = smov 0   ;;  %s1779_s28 = smov 0  }
   0x3   :  { %s1781_s29 = smov 0   ;;  %s1783_s30 = smov 0  }
   0x4 LB: > { %2080 = sst [smem:[#allocation5_spill]] %s1680_s25  ;;  %s1374_s14 = sadd.s32 4294967295, %s1700_s30   ;;  %s1700_s30 = sphi %s1783_s30, %s26_s30   ;;  %s1696_s29 = sphi %s1781_s29, %s2093_s29   ;;  %s1692_s28 = sphi %s1779_s28, %s2092_s28   ;;  %s1688_s27 = sphi %s1777_s27, %s2091_s27   ;;  %s1684_s26 = sphi %s1775_s26, %s2095_s26   ;;  %s1680_s25 = sphi %s1773_s25, %s2094_s25  }
   0x5   : > { %2081 = sst [smem:[#allocation6_spill]] %s1688_s27  ;;  %s1375_s15 = sadd.s32 4294967294, %s1700_s30  }
   0x6   : > { %2082 = sst [smem:[#allocation7_spill]] %s1696_s29  ;;  %s38_s16 = sadd.s32 1, %s1696_s29 }
   0x7   : > { %s337_s17 = sadd.s32 1, %s1688_s27  ;;  %p40_p0 = scmp.ge.s32.totalorder %s38_s16, 2 }
   0x8   : > { %p347_p1 = scmp.ne.s32.totalorder %s1688_s27, %s1684_s26  ;;  %p348_p2 = scmp.eq.s32.totalorder %s1374_s14, 1 }
   0x9   : > { %p353_p3 = scmp.ne.s32.totalorder %s1684_s26, %s1680_s25  ;;  %s2097_s16 = smov (%p40_p0, %s38_s16), 0 }
   0xa   : > { %2083 = sst [smem:[#allocation8_spill]] %s2097_s16  ;;  %p1813_p4 = por %p348_p2, %p347_p1 }
   0xb   : > { %p354_p5 = scmp.eq.s32.totalorder %s1375_s15, 1  ;;  %s332_s19 = ssub.s32 %s1696_s29, %s2097_s16 }
   0xc   : > { %p1378_p6 = scmp.ge.s32.totalorder %s1700_s30, 1  ;;  %p335_p7 = scmp.eq.s32.totalorder %s332_s19, 0 }
   0xd   : > { %p1820_p8 = por %p354_p5, %p353_p3  ;;  %p426_p9 = scmp.lt.s32.totalorder %s1700_s30, 3 }
   0xe   : > { %s1826_s21 = scalar_select %p335_p7, %s1688_s27, %s337_s17  }
   0xf   : > { %s2085_s20 = scalar_select %p1820_p8, 1, 0 }
  0x10   : > { %2087 = sst [smem:[#allocation10_spill]] %s1826_s21  ;;  %p427_p10 = pnand %p1378_p6, %p426_p9 }
  0x11   : > { %2086 = sst [smem:[#allocation9_spill]] %s2085_s20  ;;  %p480_p11 = scmp.lt.s32.totalorder (!%p427_p10), %s1692_s28, 1 }
  0x12   : > { %430 = sbr.rel (%p427_p10) target bundleno = 1133 (0x46d), region = 72  ;;  %s477_s16 = sand.u32 (!%p427_p10), 1, %s1684_s26  }
  0x13   : > { %s1379_s29 = sshll.u32 (!%p427_p10), %s477_s16, 3  ;;  %s1504_s21 = sshll.u32 (!%p427_p10), %s1692_s28, 3 }
  0x14   : > { %s1263_s27 = scalar_lea.sflag (!%p427_p10), [#allocation3], %s477_s16 }
  0x17   : > { %v1508_v0 = vld [vmem:[%s2064_s3 + $0x8] sm:$0xff]  ;;  %v1510_v1 = vld [vmem:[%s2064_s3 + $0x18] sm:$0xff]  ;;  %v1507_v4 = vld [vmem:[%s2064_s3] sm:$0xff]  ;;  %s481_s24 = scalar_select %p480_p11, %s1692_s28, 1  ;;  %vm546_vm0 = vcmask 261120   ;;  %vm916_vm1 = vcmask 64512  }
  0x18   : > { %v1512_v2 = vld [vmem:[%s2064_s3 + $0x28] sm:$0xff]  ;;  %v1514_v3 = vld [vmem:[%s2064_s3 + $0x38] sm:$0xff]  ;;  %556 = vmatpush.bf16.msra.mxu0 %v1508_v0  ;;  %581 = vmatpush.bf16.msra.mxu1 %v1510_v1  ;;  %v1509_v5 = vld [vmem:[%s2064_s3 + $0x10] sm:$0xff]  ;;  %vm1052_vm2 = vcmask 1043456  }
  0x19   : > { %606 = vmatpush.bf16.msra.mxu2 %v1512_v2  ;;  %631 = vmatpush.bf16.msra.mxu3 %v1514_v3  ;;  %v1511_v6 = vld [vmem:[%s2064_s3 + $0x20] sm:$0xff]  ;;  %v1513_v7 = vld [vmem:[%s2064_s3 + $0x30] sm:$0xff]  ;;  %s1854_s17 = sshll.u32 %s481_s24, 3  ;;  %v1516_v8 = vld [vmem:[%s2066_s5 + $0x8] sm:$0xff] }
  0x1a   : > { %v1518_v9 = vld [vmem:[%s2066_s5 + $0x18] sm:$0xff]  ;;  %s486_s14 = scalar_lea.vmem %s2061_s0, %s1854_s17  ;;  %v1520_v10 = vld [vmem:[%s2066_s5 + $0x28] sm:$0xff]  ;;  %v1515_v13 = vld [vmem:[%s2066_s5] sm:$0xff]  ;;  %s490_s19 = scalar_lea.vmem %s2062_s1, %s1854_s17 }
  0x1b   : > { %v1522_v11 = vld [vmem:[%s2066_s5 + $0x38] sm:$0xff]  ;;  %v496_v12 = vld [vmem:[%s486_s14] sm:$0xff]  ;;  %v1517_v14 = vld [vmem:[%s2066_s5 + $0x10] sm:$0xff]  ;;  %s494_s23 = scalar_lea.vmem %s2063_s2, %s1854_s17 }
  0x1c   : > { %557 = vmatpush.bf16.msra.mxu0 %v1507_v4  ;;  %582 = vmatpush.bf16.msra.mxu1 %v1509_v5  ;;  %v497_v15 = vpack.c.bf16 %v496_v12, %v496_v12  ;;  %v1519_v16 = vld [vmem:[%s2066_s5 + $0x20] sm:$0xff]  ;;  %v1521_v17 = vld [vmem:[%s2066_s5 + $0x30] sm:$0xff]  ;;  %v1528_v20 = vld [vmem:[%s2068_s7 + $0x28] sm:$0xff] }
  0x1d   : > { %607 = vmatpush.bf16.msra.mxu2 %v1511_v6  ;;  %632 = vmatpush.bf16.msra.mxu3 %v1513_v7  ;;  %v498_v18 = vld [vmem:[%s490_s19] sm:$0xff]  ;;  %v1524_v21 = vld [vmem:[%s2068_s7 + $0x8] sm:$0xff]  ;;  %v1526_v22 = vld [vmem:[%s2068_s7 + $0x18] sm:$0xff]  ;;  %s479_s19 = scalar_lea.vmem [#allocation2], %s1379_s29  ;;  %s1642_s29 = scalar_lea.hbm %s2074_s13, 16 }
  0x1e   : > { %v499_v19 = vpack.c.bf16 %v498_v18, %v498_v18  ;;  %v1527_v23 = vld [vmem:[%s2068_s7 + $0x20] sm:$0xff]  ;;  %v1525_v25 = vld [vmem:[%s2068_s7 + $0x10] sm:$0xff]  ;;  %v1530_v27 = vld [vmem:[%s2068_s7 + $0x38] sm:$0xff]  ;;  %s1276_s28 = sshll.u32 %s479_s19, 4  ;;  %s1277_s28 = int_to_ptr.vmem [resolvable:$true] %s1276_s28 }
  0x1f   : > { %1391 = vmatmul.msk.bf16.vlgmr.msra.gmra.mxu0 %vm546_vm0, %v497_v15  ;;  %1400 = vmatmul.msk.bf16.vlgmr.msra.gmra.mxu1 %vm546_vm0, %v497_v15  ;;  %v1523_v24 = vld [vmem:[%s2068_s7] sm:$0xff]  ;;  %v1529_v29 = vld [vmem:[%s2068_s7 + $0x30] sm:$0xff] }
  0x20   : > { %691 = vmatpush.bf16.msrb.mxu0 %v1516_v8  ;;  %716 = vmatpush.bf16.msrb.mxu1 %v1518_v9  ;;  %v500_v26 = vld [vmem:[%s494_s23] sm:$0xff]  ;;  %s1274_s23 = scalar_lea.hbm %s2074_s13, %s1504_s21 }
  0x21   : > { %1409 = vmatmul.msk.bf16.vlgmr.msra.gmra.mxu2 %vm546_vm0, %v497_v15  ;;  %1418 = vmatmul.msk.bf16.vlgmr.msra.gmra.mxu3 %vm546_vm0, %v497_v15  ;;  %v501_v28 = vpack.c.bf16 %v500_v26, %v500_v26  ;;  %v1591_v36 = vld [vmem:[%s2067_s6] ss:$0 sm:$0xff]  ;;  %v1592_v37 = vld [vmem:[%s2067_s6 + $0x1] ss:$0 sm:$0xff]  ;;  %v1593_v48 = vld [vmem:[%s2067_s6 + $0x2] ss:$0 sm:$0xff] }
  0x22   : > { %741 = vmatpush.bf16.msrb.mxu2 %v1520_v10  ;;  %766 = vmatpush.bf16.msrb.mxu3 %v1522_v11  ;;  %v1588_v44 = vld [vmem:[%s2065_s4 + $0x1] ss:$0 sm:$0xff]  ;;  %v1587_v47 = vld [vmem:[%s2065_s4] ss:$0 sm:$0xff]  ;;  %v1594_v49 = vld [vmem:[%s2067_s6 + $0x3] ss:$0 sm:$0xff] }
  0x23   : > { %v1589_v61 = vld [vmem:[%s2065_s4 + $0x2] ss:$0 sm:$0xff]  ;;  %v1590_v62 = vld [vmem:[%s2065_s4 + $0x3] ss:$0 sm:$0xff]  ;;  %v1595_v10 = vld [vmem:[%s2069_s8] ss:$0 sm:$0xff] }
  0x24   : > { %692 = vmatpush.bf16.msrb.mxu0 %v1515_v13  ;;  %717 = vmatpush.bf16.msrb.mxu1 %v1517_v14  ;;  %v1596_v11 = vld [vmem:[%s2069_s8 + $0x1] ss:$0 sm:$0xff]  ;;  %s1278_s24 = sshll.u32 %s1274_s23, 4  ;;  %s1279_s24 = int_to_ptr.hbm [resolvable:$true] %s1278_s24 }
  0x25   : > { %s1636_s17 = sshra.s32 %s1279_s24, 4  ;;  %s1637_s17 = int_to_ptr.hbm [resolvable:$true] %s1636_s17 }
  0x26   : > { %742 = vmatpush.bf16.msrb.mxu2 %v1519_v16  ;;  %767 = vmatpush.bf16.msrb.mxu3 %v1521_v17  ;;  %v1597_v16 = vld [vmem:[%s2069_s8 + $0x2] ss:$0 sm:$0xff]  ;;  %s1638_s21 = scalar_lea.hbm %s1637_s17, 8  ;;  %p1643_p1 = scmp.lt.s32.totalorder %s1637_s17, %s2074_s13 }
  0x27   : > { %p1639_p12 = scmp.ne.s32.totalorder %s1637_s17, %s1638_s21  ;;  %p1644_p2 = scmp.lt.s32.totalorder %s1642_s29, %s1638_s21 }
  0x28   : > { %826 = vmatpush.bf16.msra.mxu0 %v1524_v21  ;;  %851 = vmatpush.bf16.msra.mxu1 %v1526_v22 }
  0x29   : > { %p1640_p13 = pnand %p1639_p12, %p1813_p4  ;;  %p1645_p3 = por %p1644_p2, %p1643_p1 }
  0x2a   : > { %876 = vmatpush.bf16.msra.mxu2 %v1528_v20  ;;  %901 = vmatpush.bf16.msra.mxu3 %v1530_v27  ;;  %v1598_v27 = vld [vmem:[%s2069_s8 + $0x3] ss:$0 sm:$0xff] }
  0x2b   : > { %p1641_p0 = pneg %p1640_p13 }
  0x2c   : > { %827 = vmatpush.bf16.msra.mxu0 %v1523_v24  ;;  %852 = vmatpush.bf16.msra.mxu1 %v1525_v25 }
  0x2d   : > { %p1646_p5 = pnand %p1645_p3, %p1641_p0 }
  0x2e   : > { %877 = vmatpush.bf16.msra.mxu2 %v1527_v23  ;;  %902 = vmatpush.bf16.msra.mxu3 %v1529_v29 }
  0x2f   : > { %1427 = vmatmul.msk.bf16.vlgmr.msrb.gmra.mxu0 %vm546_vm0, %v499_v19  ;;  %1436 = vmatmul.msk.bf16.vlgmr.msrb.gmra.mxu1 %vm546_vm0, %v499_v19 }
  0x31   : > { %1445 = vmatmul.msk.bf16.vlgmr.msrb.gmra.mxu2 %vm546_vm0, %v499_v19  ;;  %1454 = vmatmul.msk.bf16.vlgmr.msrb.gmra.mxu3 %vm546_vm0, %v499_v19 }
  0x3f   : > { %1463 = vmatmul.msk.bf16.vlgmr.msra.gmra.mxu0 %vm546_vm0, %v501_v28  ;;  %1472 = vmatmul.msk.bf16.vlgmr.msra.gmra.mxu1 %vm546_vm0, %v501_v28 }
  0x41   : > { %1481 = vmatmul.msk.bf16.vlgmr.msra.gmra.mxu2 %vm546_vm0, %v501_v28  ;;  %1490 = vmatmul.msk.bf16.vlgmr.msra.gmra.mxu3 %vm546_vm0, %v501_v28 }
  0x9c   : > { %v559_v30 = vpop.f32.mrf.mxu0  ;;  %v584_v31 = vpop.f32.mrf.mxu1 }
  0x9d   : > { %v585_v52 = vadd.f32 %v1588_v44, %v584_v31  ;;  %v560_v55 = vadd.f32 %v1587_v47, %v559_v30 }
  0x9f   : > { %v909_v60 = vpack.c.bf16 %v585_v52, %v585_v52  ;;  %v908_v1 = vpack.c.bf16 %v560_v55, %v560_v55 }
  0xa4   : > { %v609_v32 = vpop.f32.mrf.mxu2  ;;  %v634_v33 = vpop.f32.mrf.mxu3 }
  0xa5   : > { %v561_v34 = vpop.f32.mrf.mxu0  ;;  %v586_v35 = vpop.f32.mrf.mxu1  ;;  %v610_v4 = vadd.f32 %v1589_v61, %v609_v32  ;;  %v635_v5 = vadd.f32 %v1590_v62, %v634_v33 }
  0xa7   : > { %v910_v8 = vpack.c.bf16 %v610_v4, %v610_v4  ;;  %v911_v9 = vpack.c.bf16 %v635_v5, %v635_v5 }
  0xac   : > { %v611_v38 = vpop.f32.mrf.mxu2  ;;  %v636_v39 = vpop.f32.mrf.mxu3 }
  0xad   : > { %v694_v40 = vpop.f32.mrf.mxu0  ;;  %v719_v41 = vpop.f32.mrf.mxu1 }
  0xae   : > { %v695_v42 = vadd.f32 %v1591_v36, %v694_v40  ;;  %v720_v43 = vadd.f32 %v1592_v37, %v719_v41 }
  0xb0   : > { %v912_v45 = vpack.c.bf16 %v695_v42, %v695_v42  ;;  %v913_v46 = vpack.c.bf16 %v720_v43, %v720_v43 }
  0xb2   : > { %v921_v50 = vsel %vm916_vm1, %v912_v45, 0  ;;  %v940_v51 = vsel %vm916_vm1, %v913_v46, 0 }
  0xb3   : > { %930 = vmatpush.bf16.xpose.msrb.mxu0 %v921_v50  ;;  %949 = vmatpush.bf16.xpose.msrb.mxu1 %v940_v51 }
  0xb4   : > { %v744_v53 = vpop.f32.mrf.mxu2  ;;  %v769_v54 = vpop.f32.mrf.mxu3 }
  0xb5   : > { %v745_v56 = vadd.f32 %v1593_v48, %v744_v53  ;;  %v770_v57 = vadd.f32 %v1594_v49, %v769_v54  ;;  %v696_v58 = vpop.f32.mrf.mxu0  ;;  %v721_v59 = vpop.f32.mrf.mxu1 }
  0xb7   : > { %v914_v63 = vpack.c.bf16 %v745_v56, %v745_v56  ;;  %v915_v0 = vpack.c.bf16 %v770_v57, %v770_v57 }
  0xb9   : > { %v959_v2 = vsel %vm916_vm1, %v914_v63, 0  ;;  %v978_v3 = vsel %vm916_vm1, %v915_v0, 0 }
  0xba   : > { %968 = vmatpush.bf16.xpose.msrb.mxu2 %v959_v2  ;;  %987 = vmatpush.bf16.xpose.msrb.mxu3 %v978_v3 }
  0xbb   : > { %1491 = vmatmul.msk.bf16.vlgmr.msrb.gmra.mxu0 %vm916_vm1, %v908_v1  ;;  %1492 = vmatmul.msk.bf16.vlgmr.msrb.gmra.mxu1 %vm916_vm1, %v909_v60 }
  0xbc   : > { %v746_v6 = vpop.f32.mrf.mxu2  ;;  %v771_v7 = vpop.f32.mrf.mxu3 }
  0xbd   : > { %v829_v12 = vpop.f32.mrf.mxu0  ;;  %v854_v13 = vpop.f32.mrf.mxu1 }
  0xbe   : > { %v830_v14 = vadd.f32 %v1595_v10, %v829_v12  ;;  %v855_v15 = vadd.f32 %v1596_v11, %v854_v13 }
  0xc0   : > { %v1045_v17 = vpack.c.bf16 %v830_v14, %v830_v14  ;;  %v1046_v18 = vpack.c.bf16 %v855_v15, %v855_v15 }
  0xc1   : > { %1493 = vmatmul.msk.bf16.vlgmr.msrb.gmra.mxu2 %vm916_vm1, %v910_v8  ;;  %1494 = vmatmul.msk.bf16.vlgmr.msrb.gmra.mxu3 %vm916_vm1, %v911_v9 }
  0xc2   : > { %v1054_v20 = vsel %vm1052_vm2, %v1045_v17, 0  ;;  %v1073_v21 = vsel %vm1052_vm2, %v1046_v18, 0 }
  0xc3   : > { %1063 = vmatpush.bf16.msra.mxu0 %v1054_v20  ;;  %1082 = vmatpush.bf16.msra.mxu1 %v1073_v21 }
  0xc4   : > { %v879_v19 = vpop.f32.mrf.mxu2  ;;  %v904_v28 = vpop.f32.mrf.mxu3 }
  0xc5   : > { %v880_v22 = vadd.f32 %v1597_v16, %v879_v19  ;;  %v831_v24 = vpop.f32.mrf.mxu0  ;;  %v856_v25 = vpop.f32.mrf.mxu1  ;;  %v905_v30 = vadd.f32 %v1598_v27, %v904_v28  ;;  %v1133_v28 = vld [vmem:[%s2070_s9 + $0xc] sm:$0xf] }
  0xc6   : > { %v1131_v24 = vld [vmem:[%s2070_s9 + $0x4] sm:$0xf] }
  0xc7   : > { %v1047_v23 = vpack.c.bf16 %v880_v22, %v880_v22  ;;  %v1048_v31 = vpack.c.bf16 %v905_v30, %v905_v30  ;;  %v1130_v22 = vld [vmem:[%s2070_s9] sm:$0xf]  ;;  %v1157_v25 = vsel %vm1052_vm2, %v1131_v24, 0 }
  0xc8   : > { %1166 = vmatpush.bf16.msrb.mxu1 %v1157_v25 }
  0xc9   : > { %v1092_v26 = vsel %vm1052_vm2, %v1047_v23, 0  ;;  %v1111_v32 = vsel %vm1052_vm2, %v1048_v31, 0  ;;  %v1138_v23 = vsel %vm1052_vm2, %v1130_v22, 0 }
  0xca   : > { %1101 = vmatpush.bf16.msra.mxu2 %v1092_v26  ;;  %1120 = vmatpush.bf16.msra.mxu3 %v1111_v32  ;;  %v1132_v26 = vld [vmem:[%s2070_s9 + $0x8] sm:$0xf] }
  0xcb   : > { %1147 = vmatpush.bf16.msrb.mxu0 %v1138_v23  ;;  %v1176_v27 = vsel %vm1052_vm2, %v1132_v26, 0 }
  0xcc   : > { %v881_v29 = vpop.f32.mrf.mxu2  ;;  %v906_v33 = vpop.f32.mrf.mxu3 }
  0xcd   : > { %v1195_v29 = vsel %vm1052_vm2, %v1133_v28, 0 }
  0xce   : > { %1185 = vmatpush.bf16.msrb.mxu2 %v1176_v27  ;;  %1204 = vmatpush.bf16.msrb.mxu3 %v1195_v29 }
 0x138   : > { %v932_v34 = vpop.f32.mrf.mxu0  ;;  %v951_v35 = vpop.f32.mrf.mxu1 }
 0x139   : > { %v993_v36 = vmul.f32 0.35355338, %v932_v34  ;;  %v994_v38 = vmul.f32 0.35355338, %v951_v35 }
 0x13b   : > { %v997_v37 = vsel %vm916_vm1, %v993_v36, -inf  ;;  %v1000_v41 = vsel %vm916_vm1, %v994_v38, -inf }
 0x13c   : > { %998 = vmax.xlane.f32.xlu1 %v997_v37 }
 0x140   : > { %v934_v39 = vpop.f32.mrf.mxu0  ;;  %v953_v40 = vpop.f32.mrf.mxu1 }
 0x144   : > { %v970_v42 = vpop.f32.mrf.mxu2  ;;  %v989_v43 = vpop.f32.mrf.mxu3  ;;  %1001 = vmax.xlane.f32.xlu1 %v1000_v41 }
 0x145   : > { %v995_v44 = vmul.f32 0.35355338, %v970_v42  ;;  %v996_v46 = vmul.f32 0.35355338, %v989_v43 }
 0x147   : > { %v1003_v45 = vsel %vm916_vm1, %v995_v44, -inf  ;;  %v1006_v49 = vsel %vm916_vm1, %v996_v46, -inf }
 0x148   : > { %1004 = vmax.xlane.f32.xlu0 %v1003_v45 }
 0x14c   : > { %v972_v47 = vpop.f32.mrf.mxu2  ;;  %v991_v48 = vpop.f32.mrf.mxu3 }
 0x150   : > { %1007 = vmax.xlane.f32.xlu0 %v1006_v49 }
 0x1af   : > { %v999_v50 = vpop.xlane.xlu1 %998 }
 0x1b0   : > { %v1009_v51 = vsub.f32 %v993_v36, %v999_v50 }
 0x1b2   : > { %v1013_v52 = vmul.f32 1.442695, %v1009_v51 }
 0x1b4   : > { %1602 = vpow2.f32 %v1013_v52 }
 0x1b7   : > { %v1002_v53 = vpop.xlane.xlu1 %1001 }
 0x1b8   : > { %v1010_v54 = vsub.f32 %v994_v38, %v1002_v53 }
 0x1ba   : > { %v1603_v55 = vpop.eup %1602  ;;  %v1015_v56 = vmul.f32 1.442695, %v1010_v54  ;;  %v1599_v54 = vld [vmem:[%s2071_s10] ss:$0 sm:$0xff] }
 0x1bb   : > { %v1005_v57 = vpop.xlane.xlu0 %1004  ;;  %v1021_v58 = vsel %vm916_vm1, %v1603_v55, 0.0 }
 0x1bc   : > { %1604 = vpow2.f32 %v1015_v56  ;;  %v1011_v59 = vsub.f32 %v995_v44, %v1005_v57  ;;  %1022 = vadd.xlane.f32.xlu0 %v1021_v58 }
 0x1be   : > { %v1017_v60 = vmul.f32 1.442695, %v1011_v59 }
 0x1c0   : > { %1606 = vpow2.f32 %v1017_v60  ;;  %v1702_v60 = vmov 32.0  }
 0x1c2   : > { %v1605_v61 = vpop.eup %1604 }
 0x1c3   : > { %v1008_v62 = vpop.xlane.xlu0 %1007  ;;  %v1024_v63 = vsel %vm916_vm1, %v1605_v61, 0.0 }
 0x1c4   : > { %v1012_v0 = vsub.f32 %v996_v46, %v1008_v62  ;;  %1025 = vadd.xlane.f32.xlu1 %v1024_v63 }
 0x1c6   : > { %v1607_v1 = vpop.eup %1606  ;;  %v1019_v2 = vmul.f32 1.442695, %v1012_v0 }
 0x1c7   : > { %v1027_v3 = vsel %vm916_vm1, %v1607_v1, 0.0 }
 0x1c8   : > { %1608 = vpow2.f32 %v1019_v2  ;;  %1028 = vadd.xlane.f32.xlu2 %v1027_v3 }
 0x1ce   : > { %v1609_v4 = vpop.eup %1608 }
 0x1cf   : > { %v1030_v5 = vsel %vm916_vm1, %v1609_v4, 0.0 }
 0x1d0   : > { %1031 = vadd.xlane.f32.xlu2 %v1030_v5 }
 0x22f   : > { %v1023_v6 = vpop.xlane.xlu0 %1022 }
 0x230   : > { %1610 = vrcp.f32 %v1023_v6 }
 0x236   : > { %v1611_v7 = vpop.eup %1610 }
 0x237   : > { %v1037_v8 = vmul.f32 %v1611_v7, %v1603_v55  ;;  %v1026_v9 = vpop.xlane.xlu1 %1025 }
 0x238   : > { %1612 = vrcp.f32 %v1026_v9 }
 0x239   : > { %v1041_v10 = vpack.c.bf16 %v1037_v8, %v1037_v8 }
 0x23b   : > { %v1029_v11 = vpop.xlane.xlu2 %1028  ;;  %1495 = vmatmul.msk.bf16.vlgmr.msra.gmra.mxu0 %vm916_vm1, %v1041_v10 }
 0x23c   : > { %1614 = vrcp.f32 %v1029_v11 }
 0x23e   : > { %v1613_v12 = vpop.eup %1612 }
 0x23f   : > { %v1038_v13 = vmul.f32 %v1613_v12, %v1605_v61 }
 0x241   : > { %v1042_v14 = vpack.c.bf16 %v1038_v13, %v1038_v13 }
 0x242   : > { %v1615_v15 = vpop.eup %1614 }
 0x243   : > { %v1039_v16 = vmul.f32 %v1615_v15, %v1607_v1  ;;  %v1032_v17 = vpop.xlane.xlu2 %1031  ;;  %1496 = vmatmul.msk.bf16.vlgmr.msra.gmra.mxu1 %vm916_vm1, %v1042_v14 }
 0x244   : > { %1616 = vrcp.f32 %v1032_v17  ;;  %v1600_v17 = vld [vmem:[%s2072_s11] ss:$0 sm:$0xff] }
 0x245   : > { %v1043_v18 = vpack.c.bf16 %v1039_v16, %v1039_v16  ;;  %1618 = vrcp.f32 %v1702_v60 }
 0x247   : > { %1497 = vmatmul.msk.bf16.vlgmr.msra.gmra.mxu2 %vm916_vm1, %v1043_v18 }
 0x24a   : > { %v1617_v19 = vpop.eup %1616 }
 0x24b   : > { %v1040_v20 = vmul.f32 %v1617_v19, %v1609_v4  ;;  %v1619_v61 = vpop.eup %1618 }
 0x24c   : > { %v1226_v62 = vmul.f32 32.0, %v1619_v61  ;;  %vm1230_vm3 = vweird.f32 %v1619_v61 }
 0x24d   : > { %v1044_v21 = vpack.c.bf16 %v1040_v20, %v1040_v20  ;;  %v1601_v20 = vld [vmem:[%s2073_s12] ss:$0 sm:$0xff] }
 0x24e   : > { %v1227_v63 = vsub.f32 1.0, %v1226_v62 }
 0x24f   : > { %1498 = vmatmul.msk.bf16.vlgmr.msra.gmra.mxu3 %vm916_vm1, %v1044_v21 }
 0x250   : > { %v1228_v0 = vmul.f32 %v1619_v61, %v1227_v63 }
 0x252   : > { %v1229_v1 = vadd.f32 %v1619_v61, %v1228_v0 }
 0x254   : > { %v1231_v2 = vsel %vm1230_vm3, %v1619_v61, %v1229_v1 }
 0x2b8   : > { %v1065_v30 = vpop.f32.mrf.mxu0 }
 0x2b9   : > { %v1126_v31 = vpack.c.bf16 %v1065_v30, %v1065_v30 }
 0x2bb   : > { %1499 = vmatmul.msk.bf16.vlgmr.msrb.gmra.mxu0 %vm916_vm1, %v1126_v31 }
 0x2c0   : > { %v1067_v32 = vpop.f32.mrf.mxu0  ;;  %v1084_v33 = vpop.f32.mrf.mxu1 }
 0x2c1   : > { %v1127_v34 = vpack.c.bf16 %v1084_v33, %v1084_v33 }
 0x2c3   : > { %1500 = vmatmul.msk.bf16.vlgmr.msrb.gmra.mxu1 %vm916_vm1, %v1127_v34 }
 0x2c8   : > { %v1086_v35 = vpop.f32.mrf.mxu1 }
 0x2ca   : > { %v1103_v36 = vpop.f32.mrf.mxu2 }
 0x2cb   : > { %v1128_v37 = vpack.c.bf16 %v1103_v36, %v1103_v36 }
 0x2cd   : > { %1501 = vmatmul.msk.bf16.vlgmr.msrb.gmra.mxu2 %vm916_vm1, %v1128_v37 }
 0x2d2   : > { %v1105_v38 = vpop.f32.mrf.mxu2  ;;  %v1122_v39 = vpop.f32.mrf.mxu3 }
 0x2d3   : > { %v1129_v40 = vpack.c.bf16 %v1122_v39, %v1122_v39 }
 0x2d5   : > { %1502 = vmatmul.msk.bf16.vlgmr.msrb.gmra.mxu3 %vm916_vm1, %v1129_v40 }
 0x2da   : > { %v1124_v41 = vpop.f32.mrf.mxu3 }
 0x338   : > { %v1149_v42 = vpop.f32.mrf.mxu0 }
 0x339   : > { %v1210_v48 = vsel %vm546_vm0, %v1149_v42, 0.0 }
 0x340   : > { %v1151_v43 = vpop.f32.mrf.mxu0  ;;  %v1168_v44 = vpop.f32.mrf.mxu1 }
 0x341   : > { %v1211_v47 = vsel %vm546_vm0, %v1168_v44, 0.0 }
 0x342   : > { %v1212_v50 = vadd.f32 %v1211_v47, %v1210_v48 }
 0x348   : > { %v1170_v45 = vpop.f32.mrf.mxu1 }
 0x350   : > { %v1187_v46 = vpop.f32.mrf.mxu2 }
 0x351   : > { %v1213_v49 = vsel %vm546_vm0, %v1187_v46, 0.0 }
 0x352   : > { %v1214_v51 = vadd.f32 %v1213_v49, %v1212_v50 }
 0x358   : > { %v1189_v52 = vpop.f32.mrf.mxu2  ;;  %v1206_v53 = vpop.f32.mrf.mxu3 }
 0x359   : > { %v1215_v55 = vsel %vm546_vm0, %v1206_v53, 0.0 }
 0x35a   : > { %v1216_v56 = vadd.f32 %v1215_v55, %v1214_v51 }
 0x35c   : > { %v1221_v57 = vadd.f32 %v1599_v54, %v1216_v56 }
 0x35e   : > { %v1222_v58 = vsel %vm546_vm0, %v1221_v57, 0.0 }
 0x35f   : > { %1223 = vadd.xlane.f32.xlu2 %v1222_v58 }
 0x360   : > { %v1208_v59 = vpop.f32.mrf.mxu3 }
 0x3d2   : > { %v1224_v3 = vpop.xlane.xlu2 %1223 }
 0x3d3   : > { %v1232_v4 = vmul.f32 %v1231_v2, %v1224_v3 }
 0x3d5   : > { %v1233_v5 = vsub.f32 %v1221_v57, %v1232_v4 }
 0x3d7   : > { %v1234_v6 = vmul.f32 %v1233_v5, %v1233_v5 }
 0x3d9   : > { %v1235_v7 = vsel %vm546_vm0, %v1234_v6, 0.0 }
 0x3da   : > { %1236 = vadd.xlane.f32.xlu0 %v1235_v7 }
 0x44d   : > { %v1237_v8 = vpop.xlane.xlu0 %1236 }
 0x44e   : > { %v1238_v9 = vmul.f32 %v1237_v8, %v1231_v2 }
 0x450   : > { %v1239_v10 = vadd.f32 2.5e-06, %v1238_v9 }
 0x452   : > { %1620 = vrsqrt.f32 %v1239_v10  ;;  %vm1246_vm5 = vweird.f32 %v1239_v10 }
 0x458   : > { %v1621_v11 = vpop.eup %1620 }
 0x459   : > { %v1241_v12 = vmul.f32 %v1621_v11, %v1239_v10  ;;  %vm1247_vm4 = vweird.f32 %v1621_v11 }
 0x45a   : > { %vm1248_vm6 = vmor %vm1246_vm5, %vm1247_vm4 }
 0x45b   : > { %v1242_v13 = vmul.f32 %v1621_v11, %v1241_v12 }
 0x45d   : > { %v1243_v14 = vmul.f32 0.5, %v1242_v13 }
 0x45f   : > { %v1244_v15 = vsub.f32 1.5, %v1243_v14 }
 0x461   : > { %v1245_v16 = vmul.f32 %v1621_v11, %v1244_v15 }
 0x463   : > { %v1249_v18 = vsel %vm1248_vm6, %v1621_v11, %v1245_v16 }
 0x464   : > { %v1250_v19 = vmul.f32 %v1249_v18, %v1233_v5 }
 0x466   : > { %v1255_v21 = vmul.f32 %v1600_v17, %v1250_v19 }
 0x468   : > { %v1260_v22 = vadd.f32 %v1601_v20, %v1255_v21 }
 0x46a   : > { %1261 = vst.msk [vmem:[%s479_s19] sm:$0xff] %vm546_vm0, %v1260_v22 }
 0x46b   : > { %1649 = shalt.err (!%p1646_p5)
}
 0x46c   : > { %1531 = dma.vmem_to_hbm [thread:$0]  (%p1813_p4), %s1277_s28, 128, %s1279_s24, %s1263_s27  }
 0x46d PF: > { %s2088_s16 = sld [smem:[#allocation5_spill]]  ;;  %p1537_p6 = scmp.ge.s32.totalorder %s1700_s30, 2 }
 0x46f   : > { %p1534_p7 = pnand %p1537_p6, %p1820_p8 }
 0x471   : > { %p1535_p9 = pneg %p1534_p7 }
 0x473   : > { %s1290_s15 = sand.u32 1, %s2088_s16  }
 0x474   : > { %s1291_s19 = scalar_lea.sflag [#allocation3], %s1290_s15 }
 0x475   : > { %1675 = dma.done.wait (%p1535_p9), %s1291_s19, 128  }
 0x476   : > { %1677 = vsyncadd (%p1535_p9), %s1291_s19, 4294967168  ;;  %s26_s30 = sadd.s32 1, %s1700_s30   ;;  %s2090_s17 = sld [smem:[#allocation6_spill]] }
 0x477   : > { %p23_p10 = scmp.ge.s32.totalorder %s26_s30, 4   ;;  %s2091_s27 = sld [smem:[#allocation10_spill]] }
 0x478   : > { %s2092_s28 = sld [smem:[#allocation7_spill]]  ;;  %s2094_s25 = smov %s1684_s26 }
 0x479   : > { %s2093_s29 = sld [smem:[#allocation8_spill]]  ;;  %25 = sbr.rel (!%p23_p10) target bundleno = 4 (0x4), region = 113 }
 0x47c   : > { %s2095_s26 = smov %s2090_s17 }
 0x47e   :  { %1297 = vsyncpa [#allocation3], 1 }
 0x47f   :  { %1299 = vsyncpa [#allocation3 + $0x1], 1 }

</bundles_post_ra>
